<compile_context>
chip_gen: v5e
topology: v5e:2x2
jax: 0.10.0
libtpu: 0.0.40
codegen_flags: <defaults>
</compile_context>

<pallas_src>
import functools

import jax
import jax.numpy as jnp
from jax.experimental import pallas as pl
from jax.experimental.pallas import tpu as pltpu

BN_EPS = 1e-5
H1, H2, OUT = 128, 64, 32
LANE = 128
_DEF_TK = 512  # reduction tile when input_dim is split along K


def _round_up(n, m):
    return ((n + m - 1) // m) * m


def protonet_kernel(
    x_ref,    # (bm, tk)        f32 or bf16
    w1_ref,   # (tk, 128)       same dtype as x
    w2_ref,   # (128, 128) f32  (BN folded, cols 64..127 zero-padded)
    w3_ref,   # (128, 32)  f32  (rows 64..127 zero-padded)
    b1_ref,   # (1, 128)   f32
    b2_ref,   # (1, 128)   f32  (folded, lanes 64..127 zero)
    b3_ref,   # (1, 32)    f32
    o_ref,    # (bm, 32)   f32
    acc_ref,  # (bm, 128)  f32  VMEM scratch (layer-1 accumulator)
):
    k = pl.program_id(1)

    @pl.when(k == 0)
    def _():
        acc_ref[...] = jnp.zeros_like(acc_ref)

    # Layer 1 partial product over the K tile; f32 accumulation on the MXU.
    acc_ref[...] += jnp.dot(x_ref[...], w1_ref[...],
                            preferred_element_type=jnp.float32)

    @pl.when(k == pl.num_programs(1) - 1)
    def _():
        # Dropout = identity (eval); ReLU; BatchNorm folded into w2/b2.
        h1 = jnp.maximum(acc_ref[...] + b1_ref[...], 0.0)
        h2 = jnp.dot(h1, w2_ref[...], preferred_element_type=jnp.float32) + b2_ref[...]
        h2 = jnp.maximum(h2, 0.0)
        # Linear(64, 32): narrow (32-lane) store straight to the (B, 32) output.
        o_ref[...] = (
            jnp.dot(h2, w3_ref[...], preferred_element_type=jnp.float32) + b3_ref[...]
        ).astype(o_ref.dtype)


def _fold_params(params):
    """Fold eval-mode BN into w2/b2; pad hidden dims to 128 lanes with zeros."""
    (w1, b1, gamma, beta, mean, var, w2, b2, w3, b3) = params
    scale = gamma / jnp.sqrt(var + BN_EPS)               # (1, 128)
    shift = beta - mean * scale                           # (1, 128)
    w2f = scale.reshape(-1, 1) * w2                       # (128, 64)
    b2f = shift @ w2 + b2                                 # (1, 64)

    w2p = jnp.pad(w2f, ((0, 0), (0, LANE - H2)))          # (128, 128)
    b2p = jnp.pad(b2f, ((0, 0), (0, LANE - H2)))          # (1, 128)
    w3p = jnp.pad(w3, ((0, LANE - H2), (0, 0)))           # (128, 32)
    return w1, b1, w2p, b2p, w3p, b3


def _vmem_budget_bytes():
    try:
        cap = int(pltpu.get_tpu_info().vmem_capacity_bytes)
    except Exception:
        cap = 64 * 1024 * 1024  # conservative: v7x per-TC physical VMEM
    return (cap * 3) // 4       # leave headroom for compiler internal scratch


def _vmem_est(bm, tk, x_elt):
    return (
        2 * bm * tk * x_elt                       # x tile, double buffered
        + 2 * tk * H1 * 4                         # w1 tile, double buffered
        + 2 * bm * OUT * 4                        # out tile, double buffered
        + bm * H1 * 4                             # acc scratch
        + 3 * bm * H1 * 4                         # h1/h2/epilogue intermediates
        + 2 * (H1 * LANE + H1 * OUT + 2 * LANE + OUT) * 4  # resident params (2x)
        + (2 << 20)                               # misc headroom
    )


@functools.partial(jax.jit, static_argnames=("bm", "tk"))
def protonet_forward(x, params, *, bm=1024, tk=None):
    B, input_dim = x.shape
    w1, b1, w2p, b2p, w3p, b3 = _fold_params(params)

    # bf16 is only taken when the caller already stores x as bf16 (no wrapper
    # convert pass over x in HBM); only the small w1 is cast to match.
    if x.dtype == jnp.bfloat16:
        w1 = w1.astype(jnp.bfloat16)
    x_elt = x.dtype.itemsize

    budget = _vmem_budget_bytes()

    # Batch tile: multiple of 8, capped to the padded batch; guarantee >= 2 grid
    # steps when B > 8 so the "parallel" axis can shard across v7x's two TCs.
    bm_eff = max(8, _round_up(min(int(bm), _round_up(B, 8)), 8))
    if B > 8:
        bm_eff = min(bm_eff, _round_up(pl.cdiv(B, 2), 8))

    # Reduction split over input_dim (keeps bm large without blowing VMEM).
    if tk is None:
        tk_eff = input_dim
        if input_dim > _DEF_TK and _vmem_est(bm_eff, input_dim, x_elt) > budget:
            tk_eff = _DEF_TK
    else:
        tk_eff = max(1, min(int(tk), input_dim))
    num_k = pl.cdiv(input_dim, tk_eff)

    # Shrink the batch tile (not just the scoped limit) if still over budget.
    while bm_eff > 8 and _vmem_est(bm_eff, tk_eff, x_elt) > budget:
        bm_eff = max(8, _round_up(bm_eff // 2, 8))

    # Zero-pad the reduction dim so every K block is fully in-bounds (zeros are
    # exact no-ops in the accumulation).  No-op when input_dim % tk_eff == 0.
    k_pad = num_k * tk_eff - input_dim
    if k_pad:
        # TODO(synk): for huge, odd input_dim prefer a tk that divides it to
        # avoid this extra pad pass over x in HBM.
        x = jnp.pad(x, ((0, 0), (0, k_pad)))
        w1 = jnp.pad(w1, ((0, k_pad), (0, 0)))

    vmem_limit = int(min(budget,
                         max(_vmem_est(bm_eff, tk_eff, x_elt), 32 * 1024 * 1024)))

    grid = (pl.cdiv(B, bm_eff), num_k)
    const2 = lambda a: pl.BlockSpec(a.shape, lambda i, k: (0,) * a.ndim)

    return pl.pallas_call(
        protonet_kernel,
        out_shape=jax.ShapeDtypeStruct((B, OUT), jnp.float32),
        grid_spec=pltpu.PrefetchScalarGridSpec(
            num_scalar_prefetch=0,
            grid=grid,
            in_specs=[
                pl.BlockSpec((bm_eff, tk_eff), lambda i, k: (i, k)),  # x tile
                pl.BlockSpec((tk_eff, H1), lambda i, k: (k, 0)),      # w1 tile
                const2(w2p), const2(w3p),
                const2(b1), const2(b2p), const2(b3),
            ],
            out_specs=pl.BlockSpec((bm_eff, OUT), lambda i, k: (i, 0)),
            scratch_shapes=[pltpu.VMEM((bm_eff, H1), jnp.float32)],
        ),
        compiler_params=pltpu.CompilerParams(
            dimension_semantics=("parallel", "arbitrary"),
            vmem_limit_bytes=vmem_limit,
        ),
    )(x, w1, w2p, w3p, b1, b2p, b3)


def init_params(key, input_dim):
    """Deterministic parameter init (PyTorch-style uniform(-1/sqrt(fan_in), ...))."""
    ks = jax.random.split(key, 6)

    def linear(kw, kb, fan_in, fan_out):
        bound = 1.0 / jnp.sqrt(fan_in)
        w = jax.random.uniform(kw, (fan_in, fan_out), jnp.float32, -bound, bound)
        b = jax.random.uniform(kb, (1, fan_out), jnp.float32, -bound, bound)
        return w, b

    w1, b1 = linear(ks[0], ks[1], input_dim, H1)
    w2, b2 = linear(ks[2], ks[3], H1, H2)
    w3, b3 = linear(ks[4], ks[5], H2, OUT)

    # BatchNorm1d(128): gamma=1, beta=0, running_mean=0, running_var=1
    gamma = jnp.ones((1, H1), jnp.float32)
    beta = jnp.zeros((1, H1), jnp.float32)
    mean = jnp.zeros((1, H1), jnp.float32)
    var = jnp.ones((1, H1), jnp.float32)

    return (w1, b1, gamma, beta, mean, var, w2, b2, w3, b3)


def protonet_reference(x, params):
    """Plain-JAX reference (unfolded params) for verification."""
    (w1, b1, gamma, beta, mean, var, w2, b2, w3, b3) = params
    h1 = jnp.maximum(x @ w1 + b1, 0.0)
    h1 = (h1 - mean) / jnp.sqrt(var + BN_EPS) * gamma + beta
    h2 = jnp.maximum(h1 @ w2 + b2, 0.0)
    return h2 @ w3 + b3


if __name__ == "__main__":
    key = jax.random.PRNGKey(0)
    k_x, k_p = jax.random.split(key)

    batch, input_dim = 20, 48  # non-multiple-of-8 batch exercises tail padding
    x = jax.random.normal(k_x, (batch, input_dim), jnp.float32)
    params = init_params(k_p, input_dim)

    ref = protonet_reference(x, params)

    # f32, default tile (>=2 parallel grid steps for the megacore path).
    out = jax.block_until_ready(protonet_forward(x, params))
    assert out.shape == (batch, OUT), out.shape
    assert jnp.allclose(out, ref, atol=1e-5, rtol=1e-5), "f32 mismatch vs reference"

    # Small batch tile -> multi-step grid with a ragged tail block.
    out_tiled = jax.block_until_ready(protonet_forward(x, params, bm=8))
    assert jnp.allclose(out_tiled, ref, atol=1e-5, rtol=1e-5), "tiled mismatch"

    # Forced K-split (tk=16 -> 3 reduction steps) exercises the accumulator path.
    out_ksplit = jax.block_until_ready(protonet_forward(x, params, tk=16))
    assert jnp.allclose(out_ksplit, ref, atol=1e-5, rtol=1e-5), "K-split mismatch"

    # bf16-resident x (caller-side storage) — looser tolerance.
    x_bf16 = x.astype(jnp.bfloat16)
    out_bf16 = jax.block_until_ready(protonet_forward(x_bf16, params))
    assert jnp.allclose(out_bf16, ref, atol=5e-2, rtol=5e-2), "bf16 mismatch"

    # TODO(synk): compute_and_store_prototypes / get_prototypes are stateful
    # buffer bookkeeping outside forward(); prototype mean-pooling stays in
    # plain JAX if ever needed.
    print("KERNEL_OK")
</pallas_src>

<mosaic_0001>
module attributes {stable_mosaic.version = 11 : i64} {
  func.func @protonet_kernel(%arg0: i32, %arg1: i32, %arg2: memref<16x48xf32, #tpu.memory_space<vmem>>, %arg3: memref<48x128xf32, #tpu.memory_space<vmem>>, %arg4: memref<128x128xf32, #tpu.memory_space<vmem>>, %arg5: memref<128x32xf32, #tpu.memory_space<vmem>>, %arg6: memref<1x128xf32, #tpu.memory_space<vmem>>, %arg7: memref<1x128xf32, #tpu.memory_space<vmem>>, %arg8: memref<1x32xf32, #tpu.memory_space<vmem>>, %arg9: memref<16x32xf32, #tpu.memory_space<vmem>>, %arg10: memref<16x128xf32, #tpu.memory_space<vmem>>) attributes {dimension_semantics = [#tpu.dimension_semantics<parallel>, #tpu.dimension_semantics<arbitrary>], iteration_bounds = array<i64: 2, 1>, scalar_prefetch = 0 : i64, scratch_operands = 1 : i64, tpu.core_type = #tpu.core_type<tc>, window_params = [{transform_indices = @transform_0, window_bounds = array<i64: 16, 48>}, {transform_indices = @transform_1, window_bounds = array<i64: 48, 128>}, {pipeline_mode = #tpu.pipeline_mode<synchronous>, transform_indices = @transform_2, window_bounds = array<i64: 128, 128>}, {pipeline_mode = #tpu.pipeline_mode<synchronous>, transform_indices = @transform_3, window_bounds = array<i64: 128, 32>}, {pipeline_mode = #tpu.pipeline_mode<synchronous>, transform_indices = @transform_4, window_bounds = array<i64: 1, 128>}, {pipeline_mode = #tpu.pipeline_mode<synchronous>, transform_indices = @transform_5, window_bounds = array<i64: 1, 128>}, {pipeline_mode = #tpu.pipeline_mode<synchronous>, transform_indices = @transform_6, window_bounds = array<i64: 1, 32>}, {transform_indices = @transform_7, window_bounds = array<i64: 16, 32>}]} {
    %c0_i32 = arith.constant 0 : i32
    %0 = arith.cmpi eq, %arg1, %c0_i32 : i32
    %1 = arith.extui %0 : i1 to i32
    %c0_i32_0 = arith.constant 0 : i32
    %2 = arith.cmpi ne, %1, %c0_i32_0 : i32
    scf.if %2 {
      %cst_10 = arith.constant 0.000000e+00 : f32
      %12 = vector.broadcast %cst_10 : f32 to vector<16x128xf32>
      %c0_11 = arith.constant 0 : index
      %c0_12 = arith.constant 0 : index
      %13 = vector.load %arg10[%c0_11, %c0_12] : memref<16x128xf32, #tpu.memory_space<vmem>>, vector<16x128xf32>
      tpu.vector_store %arg10[%c0_11, %c0_12], %12 {strides = array<i32>} : memref<16x128xf32, #tpu.memory_space<vmem>>, vector<16x128xf32>,
    } else {
    }
    %c0 = arith.constant 0 : index
    %c0_1 = arith.constant 0 : index
    %3 = vector.load %arg10[%c0, %c0_1] : memref<16x128xf32, #tpu.memory_space<vmem>>, vector<16x128xf32>
    %c0_2 = arith.constant 0 : index
    %c0_3 = arith.constant 0 : index
    %4 = vector.load %arg2[%c0_2, %c0_3] : memref<16x48xf32, #tpu.memory_space<vmem>>, vector<16x48xf32>
    %c0_4 = arith.constant 0 : index
    %c0_5 = arith.constant 0 : index
    %5 = vector.load %arg3[%c0_4, %c0_5] : memref<48x128xf32, #tpu.memory_space<vmem>>, vector<48x128xf32>
    %cst = arith.constant dense<0.000000e+00> : vector<16x128xf32>
    %6 = tpu.matmul %4, %5, %cst {dimension_numbers = #tpu.dot_dimension_numbers<[1], [0], [0], [1], [0, 0, 1, 1], [], []>} : vector<16x48xf32>, vector<48x128xf32>, vector<16x128xf32> -> vector<16x128xf32>
    %7 = arith.addf %3, %6 : vector<16x128xf32>
    %c0_6 = arith.constant 0 : index
    %c0_7 = arith.constant 0 : index
    %8 = vector.load %arg10[%c0_6, %c0_7] : memref<16x128xf32, #tpu.memory_space<vmem>>, vector<16x128xf32>
    tpu.vector_store %arg10[%c0_6, %c0_7], %7 {strides = array<i32>} : memref<16x128xf32, #tpu.memory_space<vmem>>, vector<16x128xf32>,
    %c0_i32_8 = arith.constant 0 : i32
    %9 = arith.cmpi eq, %arg1, %c0_i32_8 : i32
    %10 = arith.extui %9 : i1 to i32
    %c0_i32_9 = arith.constant 0 : i32
    %11 = arith.cmpi ne, %10, %c0_i32_9 : i32
    scf.if %11 {
      %c0_10 = arith.constant 0 : index
      %c0_11 = arith.constant 0 : index
      %12 = vector.load %arg10[%c0_10, %c0_11] : memref<16x128xf32, #tpu.memory_space<vmem>>, vector<16x128xf32>
      %c0_12 = arith.constant 0 : index
      %c0_13 = arith.constant 0 : index
      %13 = vector.load %arg6[%c0_12, %c0_13] : memref<1x128xf32, #tpu.memory_space<vmem>>, vector<1x128xf32>
      %14 = vector.broadcast %13 : vector<1x128xf32> to vector<16x128xf32>
      %15 = arith.addf %12, %14 : vector<16x128xf32>
      %cst_14 = arith.constant 0.000000e+00 : f32
      %16 = vector.broadcast %cst_14 : f32 to vector<16x128xf32>
      %17 = arith.maximumf %15, %16 : vector<16x128xf32>
      %c0_15 = arith.constant 0 : index
      %c0_16 = arith.constant 0 : index
      %18 = vector.load %arg4[%c0_15, %c0_16] : memref<128x128xf32, #tpu.memory_space<vmem>>, vector<128x128xf32>
      %cst_17 = arith.constant dense<0.000000e+00> : vector<16x128xf32>
      %19 = tpu.matmul %17, %18, %cst_17 {dimension_numbers = #tpu.dot_dimension_numbers<[1], [0], [0], [1], [0, 0, 1, 1], [], []>} : vector<16x128xf32>, vector<128x128xf32>, vector<16x128xf32> -> vector<16x128xf32>
      %c0_18 = arith.constant 0 : index
      %c0_19 = arith.constant 0 : index
      %20 = vector.load %arg7[%c0_18, %c0_19] : memref<1x128xf32, #tpu.memory_space<vmem>>, vector<1x128xf32>
      %21 = vector.broadcast %20 : vector<1x128xf32> to vector<16x128xf32>
      %22 = arith.addf %19, %21 : vector<16x128xf32>
      %cst_20 = arith.constant 0.000000e+00 : f32
      %23 = vector.broadcast %cst_20 : f32 to vector<16x128xf32>
      %24 = arith.maximumf %22, %23 : vector<16x128xf32>
      %c0_21 = arith.constant 0 : index
      %c0_22 = arith.constant 0 : index
      %25 = vector.load %arg5[%c0_21, %c0_22] : memref<128x32xf32, #tpu.memory_space<vmem>>, vector<128x32xf32>
      %cst_23 = arith.constant dense<0.000000e+00> : vector<16x32xf32>
      %26 = tpu.matmul %24, %25, %cst_23 {dimension_numbers = #tpu.dot_dimension_numbers<[1], [0], [0], [1], [0, 0, 1, 1], [], []>} : vector<16x128xf32>, vector<128x32xf32>, vector<16x32xf32> -> vector<16x32xf32>
      %c0_24 = arith.constant 0 : index
      %c0_25 = arith.constant 0 : index
      %27 = vector.load %arg8[%c0_24, %c0_25] : memref<1x32xf32, #tpu.memory_space<vmem>>, vector<1x32xf32>
      %28 = vector.broadcast %27 : vector<1x32xf32> to vector<16x32xf32>
      %29 = arith.addf %26, %28 : vector<16x32xf32>
      %c0_26 = arith.constant 0 : index
      %c0_27 = arith.constant 0 : index
      %30 = vector.load %arg9[%c0_26, %c0_27] : memref<16x32xf32, #tpu.memory_space<vmem>>, vector<16x32xf32>
      tpu.vector_store %arg9[%c0_26, %c0_27], %29 {strides = array<i32>} : memref<16x32xf32, #tpu.memory_space<vmem>>, vector<16x32xf32>,
    } else {
    }
    return
  }
  func.func @transform_0(%arg0: i32, %arg1: i32) -> (i32, i32) {
    %c0_i32 = arith.constant 0 : i32
    return %arg0, %arg1 : i32, i32
  }
  func.func @transform_1(%arg0: i32, %arg1: i32) -> (i32, i32) {
    %c0_i32 = arith.constant 0 : i32
    %c0_i32_0 = arith.constant 0 : i32
    return %arg1, %c0_i32 : i32, i32
  }
  func.func @transform_2(%arg0: i32, %arg1: i32) -> (i32, i32) {
    %c0_i32 = arith.constant 0 : i32
    %c0_i32_0 = arith.constant 0 : i32
    %c0_i32_1 = arith.constant 0 : i32
    return %c0_i32, %c0_i32_0 : i32, i32
  }
  func.func @transform_3(%arg0: i32, %arg1: i32) -> (i32, i32) {
    %c0_i32 = arith.constant 0 : i32
    %c0_i32_0 = arith.constant 0 : i32
    %c0_i32_1 = arith.constant 0 : i32
    return %c0_i32, %c0_i32_0 : i32, i32
  }
  func.func @transform_4(%arg0: i32, %arg1: i32) -> (i32, i32) {
    %c0_i32 = arith.constant 0 : i32
    %c0_i32_0 = arith.constant 0 : i32
    %c0_i32_1 = arith.constant 0 : i32
    return %c0_i32, %c0_i32_0 : i32, i32
  }
  func.func @transform_5(%arg0: i32, %arg1: i32) -> (i32, i32) {
    %c0_i32 = arith.constant 0 : i32
    %c0_i32_0 = arith.constant 0 : i32
    %c0_i32_1 = arith.constant 0 : i32
    return %c0_i32, %c0_i32_0 : i32, i32
  }
  func.func @transform_6(%arg0: i32, %arg1: i32) -> (i32, i32) {
    %c0_i32 = arith.constant 0 : i32
    %c0_i32_0 = arith.constant 0 : i32
    %c0_i32_1 = arith.constant 0 : i32
    return %c0_i32, %c0_i32_0 : i32, i32
  }
  func.func @transform_7(%arg0: i32, %arg1: i32) -> (i32, i32) {
    %c0_i32 = arith.constant 0 : i32
    %c0_i32_0 = arith.constant 0 : i32
    return %arg0, %c0_i32 : i32, i32
  }
}

</mosaic_0001>

<bundles_post_ra>
// kernel: protonet_forward.1
= control target key start
LH: loop header
LB: loop body
LE: loop exit
PB: predicated region body
PF: predicated region fallthrough
CT: control target
= control target key end

     0   :  { %12 = vsyncpa [#allocation4], 0  ;;  %s1098_s0 = inlined_call_operand.vmem [shape: f32[20,48], index: 0, kind: input, shape index: {}]   ;;  %s1099_s1 = inlined_call_operand.vmem [shape: f32[48,128], index: 1, kind: input, shape index: {}]   ;;  %s1100_s2 = inlined_call_operand.vmem [shape: f32[128,128], index: 2, kind: input, shape index: {}]   ;;  %s1101_s3 = inlined_call_operand.vmem [shape: f32[128,32], index: 3, kind: input, shape index: {}]   ;;  %s1102_s4 = inlined_call_operand.vmem [shape: f32[1,128], index: 4, kind: input, shape index: {}]   ;;  %s1103_s5 = inlined_call_operand.vmem [shape: f32[1,128], index: 5, kind: input, shape index: {}]   ;;  %s1104_s6 = inlined_call_operand.vmem [shape: f32[1,32], index: 6, kind: input, shape index: {}]   ;;  %s1105_s7 = inlined_call_operand.hbm [shape: f32[20,32], index: 7, kind: output, shape index: {}]  }
   0x1   :  { %14 = vsyncpa [#allocation4 + $0x1], 0  ;;  %s844_s24 = smov 0   ;;  %s846_s25 = smov 0  }
   0x2   :  { %s848_s26 = smov 0   ;;  %s850_s27 = smov 0  }
   0x3   :  { %s852_s28 = smov 0   ;;  %s854_s29 = smov 0  }
   0x4 LB: > { %s614_s30 = sadd.s32 4294967295, %s799_s29   ;;  %s615_s8 = sadd.s32 4294967294, %s799_s29   ;;  %s799_s29 = sphi %s854_s29, %s20_s29   ;;  %s795_s28 = sphi %s852_s28, %s1118_s28   ;;  %s791_s27 = sphi %s850_s27, %s1117_s27   ;;  %s787_s26 = sphi %s848_s26, %s1116_s26   ;;  %s783_s25 = sphi %s846_s25, %s1115_s25   ;;  %s779_s24 = sphi %s844_s24, %s1114_s24  }
   0x5   : > { %s32_s9 = sadd.s32 1, %s795_s28  ;;  %s198_s10 = sadd.s32 1, %s787_s26 }
   0x6   : > { %p34_p0 = scmp.ge.s32.totalorder %s32_s9, 2  ;;  %p208_p1 = scmp.ne.s32.totalorder %s787_s26, %s783_s25 }
   0x7   : > { %p209_p2 = scmp.eq.s32.totalorder %s614_s30, 1  ;;  %p214_p3 = scmp.ne.s32.totalorder %s783_s25, %s779_s24 }
   0x8   : > { %s1120_s9 = smov (%p34_p0, %s32_s9), 0  ;;  %p215_p5 = scmp.eq.s32.totalorder %s615_s8, 1 }
   0x9   : > { %1108 = sst [smem:[#allocation6_spill]] %s1120_s9  ;;  %p884_p4 = por %p209_p2, %p208_p1 }
   0xa   : > { %s195_s12 = ssub.s32 %s795_s28, %s1120_s9  ;;  %p619_p6 = scmp.ge.s32.totalorder %s799_s29, 1 }
   0xb   : > { %p196_p7 = scmp.eq.s32.totalorder %s195_s12, 0  ;;  %p891_p8 = por %p215_p5, %p214_p3 }
   0xc   : > { %p277_p9 = scmp.lt.s32.totalorder %s799_s29, 3 }
   0xd   : > { %s897_s14 = scalar_select %p196_p7, %s787_s26, %s198_s10  }
   0xe   : > { %p278_p10 = pnand %p619_p6, %p277_p9 }
   0xf   : > { %s906_s19 = sshll.u32 (!%p278_p10), %s791_s27, 1  ;;  %s318_s23 = sand.u32 (!%p278_p10), 1, %s783_s25  }
  0x10   : > { %281 = sbr.rel (%p278_p10) target bundleno = 474 (0x1da), region = 48  ;;  %p326_p11 = scmp.lt.s32.totalorder (!%p278_p10), %s906_s19, 2 }
  0x11   : > { %s620_s8 = sshll.u32 (!%p278_p10), %s318_s23, 4  ;;  %s1033_s17 = scalar_lea.sflag (!%p278_p10), [#allocation4], %s318_s23 }
  0x12   : > { %s320_s16 = scalar_lea.vmem (!%p278_p10), [#allocation3], %s620_s8 }
  0x15   : > { %v364_v0 = vld [vmem:[%s1099_s1 + $0x28] sm:$0xff]  ;;  %v363_v1 = vld [vmem:[%s1099_s1 + $0x20] sm:$0xff]  ;;  %v362_v2 = vld [vmem:[%s1099_s1 + $0x18] sm:$0xff]  ;;  %s327_s10 = scalar_select %p326_p11, %s906_s19, 2  ;;  %vm365_vm0 = vcmask 392192   ;;  %vm500_vm1 = vcmask 261120  }
  0x16   : > { %382 = vmatpush.msra.mxu0 %v364_v0  ;;  %v427_v3 = vld [vmem:[%s1100_s2 + $0x78] sm:$0xff]  ;;  %v426_v4 = vld [vmem:[%s1100_s2 + $0x70] sm:$0xff]  ;;  %v425_v6 = vld [vmem:[%s1100_s2 + $0x68] sm:$0xff] }
  0x17   : > { %432 = vmatpush.msra.mxu1 %v427_v3  ;;  %v361_v5 = vld [vmem:[%s1099_s1 + $0x10] sm:$0xff]  ;;  %635 = vmatpush.msra.mxu3 %v427_v3  ;;  %v360_v7 = vld [vmem:[%s1099_s1 + $0x8] sm:$0xff]  ;;  %s622_s21 = sshll.u32 %s327_s10, 3  ;;  %v424_v8 = vld [vmem:[%s1100_s2 + $0x60] sm:$0xff]  ;;  %s512_s10 = ssub.s32 (%p884_p4), 3, %s906_s19 }
  0x18   : > { %383 = vmatpush.msra.mxu0 %v363_v1  ;;  %s332_s30 = scalar_lea.vmem %s1098_s0, %s622_s21  ;;  %v359_v9 = vld [vmem:[%s1099_s1] sm:$0xff]  ;;  %v423_v10 = vld [vmem:[%s1100_s2 + $0x58] sm:$0xff]  ;;  %v422_v12 = vld [vmem:[%s1100_s2 + $0x50] sm:$0xff]  ;;  %p513_p12 = scmp.lt.s32.totalorder (%p884_p4), %s512_s10, 2 }
  0x19   : > { %433 = vmatpush.msra.mxu1 %v426_v4  ;;  %636 = vmatpush.msra.mxu3 %v426_v4  ;;  %v357_v11 = vld [vmem:[%s332_s30] sm:$0xff]  ;;  %v421_v13 = vld [vmem:[%s1100_s2 + $0x48] sm:$0xff]  ;;  %v419_v15 = vld [vmem:[%s1100_s2 + $0x38] sm:$0xff] }
  0x1a   : > { %384 = vmatpush.msra.mxu0 %v362_v2  ;;  %v420_v14 = vld [vmem:[%s1100_s2 + $0x40] sm:$0xff]  ;;  %v358_v16 = vld [vmem:[%s332_s30 + $0x8] sm:$0xff]  ;;  %v418_v17 = vld [vmem:[%s1100_s2 + $0x30] sm:$0xff] }
  0x1b   : > { %434 = vmatpush.msra.mxu1 %v425_v6  ;;  %637 = vmatpush.msra.mxu3 %v425_v6  ;;  %v417_v18 = vld [vmem:[%s1100_s2 + $0x28] sm:$0xff]  ;;  %v416_v19 = vld [vmem:[%s1100_s2 + $0x20] sm:$0xff]  ;;  %v415_v20 = vld [vmem:[%s1100_s2 + $0x18] sm:$0xff] }
  0x1c   : > { %385 = vmatpush.msra.mxu0 %v361_v5  ;;  %v414_v21 = vld [vmem:[%s1100_s2 + $0x10] sm:$0xff]  ;;  %v413_v22 = vld [vmem:[%s1100_s2 + $0x8] sm:$0xff]  ;;  %v412_v23 = vld [vmem:[%s1100_s2] sm:$0xff] }
  0x1d   : > { %435 = vmatpush.msra.mxu1 %v424_v8  ;;  %638 = vmatpush.msra.mxu3 %v424_v8  ;;  %v472_v24 = vld [vmem:[%s1101_s3 + $0x78] sm:$0xff]  ;;  %v471_v25 = vld [vmem:[%s1101_s3 + $0x70] sm:$0xff]  ;;  %v470_v26 = vld [vmem:[%s1101_s3 + $0x68] sm:$0xff] }
  0x1e   : > { %386 = vmatpush.msra.mxu0 %v360_v7  ;;  %477 = vmatpush.msra.mxu2 %v472_v24  ;;  %v469_v27 = vld [vmem:[%s1101_s3 + $0x60] sm:$0xff]  ;;  %v468_v28 = vld [vmem:[%s1101_s3 + $0x58] sm:$0xff]  ;;  %v467_v29 = vld [vmem:[%s1101_s3 + $0x50] sm:$0xff] }
  0x1f   : > { %436 = vmatpush.msra.mxu1 %v423_v10  ;;  %639 = vmatpush.msra.mxu3 %v423_v10  ;;  %v466_v30 = vld [vmem:[%s1101_s3 + $0x48] sm:$0xff]  ;;  %v465_v31 = vld [vmem:[%s1101_s3 + $0x40] sm:$0xff]  ;;  %v464_v32 = vld [vmem:[%s1101_s3 + $0x38] sm:$0xff] }
  0x20   : > { %387 = vmatpush.msra.mxu0 %v359_v9  ;;  %478 = vmatpush.msra.mxu2 %v471_v25  ;;  %v707_v33 = vld [vmem:[%s1102_s4] ss:$0 sm:$0xff]  ;;  %v463_v34 = vld [vmem:[%s1101_s3 + $0x30] sm:$0xff]  ;;  %v462_v35 = vld [vmem:[%s1101_s3 + $0x28] sm:$0xff] }
  0x21   : > { %623 = vmatmul.msk.f32.vlgmr.msra.gmra.mxu0 %vm365_vm0, %v357_v11  ;;  %437 = vmatpush.msra.mxu1 %v422_v12  ;;  %v461_v38 = vld [vmem:[%s1101_s3 + $0x20] sm:$0xff]  ;;  %v460_v40 = vld [vmem:[%s1101_s3 + $0x18] sm:$0xff]  ;;  %v459_v44 = vld [vmem:[%s1101_s3 + $0x10] sm:$0xff] }
  0x22   : > { %640 = vmatpush.msra.mxu3 %v422_v12  ;;  %479 = vmatpush.msra.mxu2 %v470_v26  ;;  %v458_v45 = vld [vmem:[%s1101_s3 + $0x8] sm:$0xff]  ;;  %v457_v46 = vld [vmem:[%s1101_s3] sm:$0xff] }
  0x23   : > { %438 = vmatpush.msra.mxu1 %v421_v13  ;;  %v708_v47 = vld [vmem:[%s1103_s5] ss:$0 sm:$0xff] }
  0x24   : > { %641 = vmatpush.msra.mxu3 %v421_v13  ;;  %480 = vmatpush.msra.mxu2 %v469_v27  ;;  %v709_v54 = vld [vmem:[%s1104_s6] ss:$0 sm:$0xff] }
  0x25   : > { %439 = vmatpush.msra.mxu1 %v420_v14 }
  0x26   : > { %642 = vmatpush.msra.mxu3 %v420_v14  ;;  %481 = vmatpush.msra.mxu2 %v468_v28 }
  0x27   : > { %440 = vmatpush.msra.mxu1 %v419_v15 }
  0x28   : > { %643 = vmatpush.msra.mxu3 %v419_v15  ;;  %482 = vmatpush.msra.mxu2 %v467_v29 }
  0x29   : > { %624 = vmatmul.msk.f32.gmra.mxu0 %vm365_vm0, %v358_v16  ;;  %441 = vmatpush.msra.mxu1 %v418_v17 }
  0x2a   : > { %644 = vmatpush.msra.mxu3 %v418_v17  ;;  %483 = vmatpush.msra.mxu2 %v466_v30 }
  0x2b   : > { %442 = vmatpush.msra.mxu1 %v417_v18 }
  0x2c   : > { %645 = vmatpush.msra.mxu3 %v417_v18  ;;  %484 = vmatpush.msra.mxu2 %v465_v31 }
  0x2d   : > { %443 = vmatpush.msra.mxu1 %v416_v19 }
  0x2e   : > { %646 = vmatpush.msra.mxu3 %v416_v19  ;;  %485 = vmatpush.msra.mxu2 %v464_v32 }
  0x2f   : > { %444 = vmatpush.msra.mxu1 %v415_v20 }
  0x30   : > { %647 = vmatpush.msra.mxu3 %v415_v20  ;;  %486 = vmatpush.msra.mxu2 %v463_v34 }
  0x31   : > { %445 = vmatpush.msra.mxu1 %v414_v21 }
  0x32   : > { %648 = vmatpush.msra.mxu3 %v414_v21  ;;  %487 = vmatpush.msra.mxu2 %v462_v35 }
  0x33   : > { %446 = vmatpush.msra.mxu1 %v413_v22 }
  0x34   : > { %649 = vmatpush.msra.mxu3 %v413_v22  ;;  %488 = vmatpush.msra.mxu2 %v461_v38 }
  0x35   : > { %447 = vmatpush.msra.mxu1 %v412_v23 }
  0x36   : > { %650 = vmatpush.msra.mxu3 %v412_v23  ;;  %489 = vmatpush.msra.mxu2 %v460_v40 }
  0x38   : > { %490 = vmatpush.msra.mxu2 %v459_v44 }
  0x3a   : > { %491 = vmatpush.msra.mxu2 %v458_v45 }
  0x3c   : > { %492 = vmatpush.msra.mxu2 %v457_v46 }
  0x9e   : > { %v389_v36 = vpop.f32.mrf.mxu0 }
  0x9f   : > { %v408_v37 = vadd.f32 %v707_v33, %v389_v36 }
  0xa1   : > { %v410_v39 = vmax.f32 %v408_v37, 0.0 }
  0xa3   : > { %448 = vmatmul.f32.vlgmr.msra.gmra.mxu1 %v410_v39 }
  0xa6   : > { %v392_v41 = vpop.f32.mrf.mxu0 }
  0xa7   : > { %v409_v42 = vadd.f32 %v707_v33, %v392_v41 }
  0xa9   : > { %v411_v43 = vmax.f32 %v409_v42, 0.0 }
  0xab   : > { %451 = vmatmul.f32.vlgmr.msra.gmra.mxu3 %v411_v43 }
 0x120   : > { %v449_v48 = vpop.f32.mrf.mxu1 }
 0x121   : > { %v450_v49 = vadd.f32 %v708_v47, %v449_v48 }
 0x123   : > { %v455_v50 = vmax.f32 %v450_v49, 0.0 }
 0x125   : > { %493 = vmatmul.f32.vlgmr.msra.gmra.mxu2 %v455_v50 }
 0x12e   : > { %v452_v51 = vpop.f32.mrf.mxu3 }
 0x12f   : > { %v453_v52 = vadd.f32 %v708_v47, %v452_v51 }
 0x131   : > { %v456_v53 = vmax.f32 %v453_v52, 0.0 }
 0x133   : > { %496 = vmatmul.f32.gmra.mxu2 %v456_v53 }
 0x1a8   : > { %v494_v55 = vpop.f32.mrf.mxu2 }
 0x1a9   : > { %v495_v56 = vadd.f32 %v709_v54, %v494_v55 }
 0x1ab   : > { %501 = vst.msk [vmem:[%s320_s16] sm:$0xff] %vm500_vm1, %v495_v56 }
 0x1b5   : > { %510 = sbr.rel (!%p884_p4) target bundleno = 474 (0x1da), region = 60 }
 0x1b6   : > { %v497_v57 = vpop.f32.mrf.mxu2 }
 0x1b7   : > { %v498_v58 = vadd.f32 %v709_v54, %v497_v57 }
 0x1b9   : > { %502 = vst.msk [vmem:[%s320_s16 + $0x8] sm:$0xff] %vm500_vm1, %v498_v58 }
 0x1ba   : > { %s1122_s10 = smov (!%p513_p12, %s512_s10), 2 }
 0x1bb   : > { %s627_s18 = sshll.u32 %s1122_s10, 3 }
 0x1bc   : > { %s516_s30 = ssub.s32 16, %s627_s18 }
 0x1bd   : > { %s517_s9 = sshll.u32 %s516_s30, 4 }
 0x1be   : > { %518 = vsyncadd %s1033_s17, %s517_s9  ;;  %p1042_p13 = scmp.ne.s32.totalorder %s627_s18, 0  ;;  %s634_s11 = sshll.u32 %s791_s27, 4 }
 0x1bf   : > { %s521_s19 = scalar_lea.hbm %s1105_s7, %s634_s11  ;;  %s523_s23 = sshll.u32 %s320_s16, 4  ;;  %s1050_s23 = int_to_ptr.vmem [resolvable:$true] %s523_s23 }
 0x1c0   : > { %s525_s8 = sshll.u32 %s521_s19, 4  ;;  %s1107_s12 = sshll.u32 %s1122_s10, 7  ;;  %s1052_s8 = int_to_ptr.hbm [resolvable:$true] %s525_s8 }
 0x1c1   : > { %s710_s15 = sshra.s32 %s1050_s23, 4  ;;  %s712_s18 = sshrl.u32 %s1107_s12, 4  ;;  %s711_s15 = int_to_ptr.vmem [resolvable:$true] %s710_s15 }
 0x1c2   : > { %s717_s30 = scalar_lea.vmem %s711_s15, %s712_s18  ;;  %s801_s27 = smov [#allocation3]  }
 0x1c3   : > { %p718_p0 = scmp.ne.s32.totalorder %s711_s15, %s717_s30  ;;  %s721_s9 = scalar_lea.vmem %s801_s27, 32 }
 0x1c4   : > { %p723_p3 = scmp.lt.s32.totalorder %s721_s9, %s717_s30 }
 0x1c5   : > { %p719_p1 = pnand %p718_p0, %p1042_p13 }
 0x1c7   : > { %p720_p2 = pneg %p719_p1 }
 0x1c9   : > { %p725_p4 = pnand %p723_p3, %p720_p2 }
 0x1cb   : > { %728 = shalt.err (!%p725_p4)
}
 0x1cc   : > { %s729_s16 = sshra.s32 %s1052_s8, 4  ;;  %s740_s19 = scalar_lea.hbm %s1105_s7, 24  ;;  %s730_s16 = int_to_ptr.hbm [resolvable:$true] %s729_s16 }
 0x1cd   : > { %s736_s11 = scalar_lea.hbm %s730_s16, %s712_s18  ;;  %p741_p9 = scmp.lt.s32.totalorder %s730_s16, %s1105_s7 }
 0x1ce   : > { %p737_p5 = scmp.ne.s32.totalorder %s730_s16, %s736_s11  ;;  %p742_p10 = scmp.lt.s32.totalorder %s740_s19, %s736_s11 }
 0x1d0   : > { %p738_p6 = pnand %p737_p5, %p1042_p13  ;;  %p743_p11 = por %p742_p10, %p741_p9 }
 0x1d2   : > { %p739_p7 = pneg %p738_p6 }
 0x1d4   : > { %p744_p12 = pnand %p743_p11, %p739_p7 }
 0x1d6   : > { %747 = shalt.err (!%p744_p12)
}
 0x1d7   : > { %s802_s30 = smov 128   ;;  %s803_s18 = smov 8  }
 0x1d8   : > { %s1112_s27 = sshll.u32 %s1122_s10, 7 }
 0x1d9   : > { %531 = dma.vmem_to_hbm [thread:$0]  (%p1042_p13), %s1050_s23, %s1112_s27, %s1052_s8, %s1033_s17, %s802_s30, %s802_s30, %s803_s18  }
 0x1da PF: > { %p656_p0 = scmp.ge.s32.totalorder %s799_s29, 2  ;;  %s540_s12 = sand.u32 1, %s779_s24  }
 0x1db   : > { %s541_s9 = scalar_lea.sflag [#allocation4], %s540_s12 }
 0x1dc   : > { %p653_p1 = pnand %p656_p0, %p891_p8 }
 0x1de   : > { %p654_p2 = pneg %p653_p1 }
 0x1e0   : > { %774 = dma.done.wait (%p654_p2), %s541_s9, 256  }
 0x1e1   : > { %776 = vsyncadd (%p654_p2), %s541_s9, 4294967040  ;;  %s20_s29 = sadd.s32 1, %s799_s29   ;;  %s1113_s17 = sld [smem:[#allocation6_spill]] }
 0x1e2   : > { %p17_p3 = scmp.ge.s32.totalorder %s20_s29, 4   ;;  %s1114_s24 = smov %s783_s25 }
 0x1e3   : > { %s1115_s25 = smov %s787_s26  ;;  %s1116_s26 = smov %s897_s14 }
 0x1e4   : > { %s1117_s27 = smov %s795_s28  ;;  %19 = sbr.rel (!%p17_p3) target bundleno = 4 (0x4), region = 94 }
 0x1e7   : > { %s1118_s28 = smov %s1113_s17 }
 0x1e9   :  { %547 = vsyncpa [#allocation4], 1 }
 0x1ea   :  { %549 = vsyncpa [#allocation4 + $0x1], 1 }

</bundles_post_ra>
